<compile_context>
chip_gen: v5e
topology: v5e:2x2
jax: 0.10.0
libtpu: 0.0.40
codegen_flags: <defaults>
</compile_context>

<pallas_src>
import functools
import math

import numpy as np
import jax
import jax.numpy as jnp
from jax import lax
from jax.experimental import pallas as pl
from jax.experimental.pallas import tpu as pltpu


def _round_up(a, b):
    return -(-a // b) * b


def positionalencoding2d(d_model, height, width):
    """NumPy replica of the PyTorch helper; returns (d_model, height, width)."""
    if d_model % 4 != 0:
        raise ValueError(
            "Cannot use sin/cos positional encoding with odd dimension "
            f"(got dim={d_model})"
        )
    pe = np.zeros((d_model, height, width), dtype=np.float32)
    dm = d_model // 2
    div_term = np.exp(np.arange(0.0, dm, 2) * -(math.log(10000.0) / dm))
    pos_w = np.arange(0.0, width)[:, None]    # (W, 1)
    pos_h = np.arange(0.0, height)[:, None]   # (H, 1)
    sw = np.sin(pos_w * div_term).T           # (dm/2, W)
    cw = np.cos(pos_w * div_term).T
    sh = np.sin(pos_h * div_term).T           # (dm/2, H)
    ch = np.cos(pos_h * div_term).T
    pe[0:dm:2, :, :] = np.repeat(sw[:, None, :], height, axis=1)
    pe[1:dm:2, :, :] = np.repeat(cw[:, None, :], height, axis=1)
    pe[dm::2, :, :] = np.repeat(sh[:, :, None], width, axis=2)
    pe[dm + 1::2, :, :] = np.repeat(ch[:, :, None], width, axis=2)
    return pe


def _pe_add_kernel(idx_ref, x_ref, pe_ref, o_ref, *, hw_chunk, gather_dtype):
    """One token-tile grid step.

    idx_ref : VMEM (TILE_N, 1) int32     -- flat PE row index (h*W + w) per token
    x_ref   : VMEM (TILE_N, D)           -- token tile
    pe_ref  : VMEM (HW_pad, D)           -- flattened PE table, pre-scaled by 0.1
    o_ref   : VMEM (TILE_N, D)
    """
    tile_n, d = x_ref.shape
    hw_pad = pe_ref.shape[0]
    n_chunks = hw_pad // hw_chunk

    idx = idx_ref[...]                                             # (TILE_N, 1)
    # Hoisted base iota; per-chunk we only shift the (TILE_N, 1) index column.
    iota = lax.broadcasted_iota(jnp.int32, (tile_n, hw_chunk), 1)

    def body(c, acc):
        base = c * hw_chunk
        # 0/1 one-hot is exact in bf16 and f32.
        onehot = (iota == (idx - base)).astype(gather_dtype)       # (TILE_N, CHUNK)
        rows = pe_ref[pl.ds(pl.multiple_of(base, hw_chunk), hw_chunk), :]
        # Vectorized gather on the MXU: (TILE_N, CHUNK) @ (CHUNK, D) -> (TILE_N, D).
        return acc + jnp.dot(onehot, rows, preferred_element_type=jnp.float32)

    pos = lax.fori_loop(0, n_chunks, body,
                        jnp.zeros((tile_n, d), jnp.float32), unroll=True)

    # Single fused full-tile store (0.1 scale already baked into pe_ref).
    o_ref[...] = (x_ref[...].astype(jnp.float32) + pos).astype(o_ref.dtype)


class FixedPositionalEncoding2dPallas:
    def __init__(self, embedding_dim, height, width, gather_dtype=jnp.float32):
        self.D = embedding_dim
        self.H = height
        self.W = width
        self.HW = height * width
        self.gather_dtype = jnp.dtype(gather_dtype)

        # In-kernel gather chunk (lane dim of the one-hot): multiple of 128, <= 1024.
        self.hw_chunk = min(1024, _round_up(self.HW, 128))
        self.hw_pad = _round_up(self.HW, self.hw_chunk)

        pe = positionalencoding2d(embedding_dim, height, width)   # (D, H, W)
        # pe_flat[h*W + w, :] == pe[:, h, w]; bake in the 0.1 scale.
        pe_flat = 0.1 * np.transpose(pe, (1, 2, 0)).reshape(self.HW, embedding_dim)
        if self.hw_pad != self.HW:
            pe_flat = np.pad(pe_flat, ((0, self.hw_pad - self.HW), (0, 0)))
        self.pe_flat = jnp.asarray(pe_flat, dtype=self.gather_dtype)

    def _pick_tile_n(self, bn):
        # Size tiles by bytes: ~2 MiB x tile, one-hot chunk bounded to ~4 MiB.
        g = self.gather_dtype.itemsize
        tile_from_x = (2 << 20) // max(1, self.D * 4)
        tile_from_onehot = (4 << 20) // max(1, self.hw_chunk * g)
        tile_n = max(256, min(tile_from_x, tile_from_onehot, 8192))
        tile_n = (tile_n // 8) * 8
        if bn <= tile_n:
            return bn          # full-extent block is always legal
        return tile_n

    def __call__(self, x, coord):
        # x: (B, N, D) float, coord: (B, N, 2) float
        B, N, D = x.shape
        assert D == self.D
        BN = B * N
        # PyTorch type promotion: half/bf16 x + f32 pe buffer -> f32 output.
        out_dtype = jnp.result_type(x.dtype, jnp.float32)

        # (coord / 100).long(): truncation toward zero.  Clamp h and w
        # separately so an out-of-range coord maps to the nearest valid cell
        # (never an unchecked VMEM read, never a wrap to a wrong row).
        ij = (coord / 100.0).astype(jnp.int32)
        ih = jnp.clip(ij[..., 0], 0, self.H - 1)
        iw = jnp.clip(ij[..., 1], 0, self.W - 1)
        idx = (ih * self.W + iw).reshape(BN, 1).astype(jnp.int32)
        x2 = x.reshape(BN, D)   # leading-dim collapse: no data movement

        tile_n = self._pick_tile_n(BN)
        n_tiles = pl.cdiv(BN, tile_n)   # ragged last block handled by Pallas

        # Constant table (constant index_map -> fetched once); single-buffer it.
        pe_idx_map = lambda t: (0, 0)
        try:
            pe_spec = pl.BlockSpec((self.hw_pad, D), pe_idx_map,
                                   pipeline_mode=pl.Buffered(1))
            pe_bufs = 1
        except Exception:
            pe_spec = pl.BlockSpec((self.hw_pad, D), pe_idx_map)
            pe_bufs = 2

        grid_spec = pltpu.PrefetchScalarGridSpec(
            num_scalar_prefetch=0,
            grid=(n_tiles,),
            in_specs=[
                pl.BlockSpec((tile_n, 1), lambda t: (t, 0)),   # idx tile
                pl.BlockSpec((tile_n, D), lambda t: (t, 0)),   # x tile
                pe_spec,                                       # resident PE table
            ],
            out_specs=pl.BlockSpec((tile_n, D), lambda t: (t, 0)),
        )

        # VMEM budget from the actual footprint, capped per-generation.
        g = self.gather_dtype.itemsize
        est = (2 * tile_n * D * (jnp.dtype(x.dtype).itemsize
                                 + jnp.dtype(out_dtype).itemsize)   # x/out (2 bufs)
               + 2 * tile_n * 4                                     # idx tiles
               + pe_bufs * self.hw_pad * D * g                      # PE table
               + 2 * tile_n * self.hw_chunk * g                     # one-hot chunk
               + tile_n * D * 4                                     # f32 accumulator
               + (4 << 20))                                         # headroom
        try:
            vmem_cap = int(pltpu.get_tpu_info().vmem_capacity_bytes)
        except Exception:
            vmem_cap = 64 * 1024 * 1024
        vmem_limit = int(min(max(est, 32 << 20), int(0.85 * vmem_cap)))

        kernel = functools.partial(_pe_add_kernel,
                                   hw_chunk=self.hw_chunk,
                                   gather_dtype=self.gather_dtype)

        out = pl.pallas_call(
            kernel,
            out_shape=jax.ShapeDtypeStruct((BN, D), out_dtype),
            grid_spec=grid_spec,
            compiler_params=pltpu.CompilerParams(
                dimension_semantics=("parallel",),
                vmem_limit_bytes=vmem_limit,
            ),
        )(idx, x2, self.pe_flat)

        return out.reshape(B, N, D)


if __name__ == "__main__":
    B, N, D, H, W = 2, 8, 32, 16, 16

    key = jax.random.PRNGKey(0)
    kx, kh, kw = jax.random.split(key, 3)
    x = jax.random.normal(kx, (B, N, D), dtype=jnp.float32)
    # Coord components drawn so (coord/100).long() lands inside the H/W grid.
    ch = jax.random.uniform(kh, (B, N, 1), dtype=jnp.float32,
                            minval=0.0, maxval=100.0 * H - 1.0)
    cw = jax.random.uniform(kw, (B, N, 1), dtype=jnp.float32,
                            minval=0.0, maxval=100.0 * W - 1.0)
    coord = jnp.concatenate([ch, cw], axis=-1)

    # Pure-JAX reference mirroring the PyTorch forward exactly.
    pe = jnp.asarray(positionalencoding2d(D, H, W))               # (D, H, W)
    ij = (coord / 100.0).astype(jnp.int32)
    pos_ref = jnp.transpose(pe[:, ij[..., 0], ij[..., 1]], (1, 2, 0))  # (B, N, D)
    ref = x + 0.1 * pos_ref

    # Exact (f32 gather) path — bit-level match to the PyTorch semantics.
    mod_f32 = FixedPositionalEncoding2dPallas(D, H, W, gather_dtype=jnp.float32)
    out_f32 = jax.block_until_ready(mod_f32(x, coord))
    np.testing.assert_allclose(np.asarray(out_f32), np.asarray(ref),
                               rtol=1e-6, atol=1e-6)

    # Fast (bf16 single-pass MXU) path — PE values bf16-rounded (~2e-4 abs).
    mod_bf16 = FixedPositionalEncoding2dPallas(D, H, W, gather_dtype=jnp.bfloat16)
    out_bf16 = jax.block_until_ready(mod_bf16(x, coord))
    np.testing.assert_allclose(np.asarray(out_bf16), np.asarray(ref),
                               rtol=0.0, atol=2e-3)

    print("KERNEL_OK")
</pallas_src>

<mosaic_0001>
module attributes {stable_mosaic.version = 11 : i64} {
  func.func @_pe_add_kernel(%arg0: i32, %arg1: memref<16x1xi32, #tpu.memory_space<vmem>>, %arg2: memref<16x32xf32, #tpu.memory_space<vmem>>, %arg3: memref<256x32xf32, #tpu.memory_space<vmem>>, %arg4: memref<16x32xf32, #tpu.memory_space<vmem>>) attributes {dimension_semantics = [#tpu.dimension_semantics<parallel>], iteration_bounds = array<i64: 1>, scalar_prefetch = 0 : i64, scratch_operands = 0 : i64, tpu.core_type = #tpu.core_type<tc>, window_params = [{transform_indices = @transform_0, window_bounds = array<i64: 16, 1>}, {transform_indices = @transform_1, window_bounds = array<i64: 16, 32>}, {pipeline_mode = #tpu.pipeline_mode<synchronous>, transform_indices = @transform_2, window_bounds = array<i64: 256, 32>}, {transform_indices = @transform_3, window_bounds = array<i64: 16, 32>}]} {
    %c0 = arith.constant 0 : index
    %c0_0 = arith.constant 0 : index
    %0 = vector.load %arg1[%c0, %c0_0] : memref<16x1xi32, #tpu.memory_space<vmem>>, vector<16x1xi32>
    %1 = tpu.iota {dimensions = array<i32: 1>} : vector<16x256xi32>
    %cst = arith.constant 0.000000e+00 : f32
    %2 = vector.broadcast %cst : f32 to vector<16x32xf32>
    %c0_i32 = arith.constant 0 : i32
    %c256_i32 = arith.constant 256 : i32
    %3 = arith.muli %c0_i32, %c256_i32 : i32
    %4 = vector.broadcast %3 : i32 to vector<16x1xi32>
    %5 = arith.subi %0, %4 : vector<16x1xi32>
    %6 = vector.broadcast %5 : vector<16x1xi32> to vector<16x256xi32>
    %7 = arith.cmpi eq, %1, %6 : vector<16x256xi32>
    %8 = arith.extui %7 : vector<16x256xi1> to vector<16x256xi32>
    %9 = arith.sitofp %8 : vector<16x256xi32> to vector<16x256xf32>
    %10 = tpu.assume_multiple %3, 256 : i32
    %11 = arith.index_cast %10 : i32 to index
    %c0_1 = arith.constant 0 : index
    %12 = vector.load %arg3[%11, %c0_1] : memref<256x32xf32, #tpu.memory_space<vmem>>, vector<256x32xf32>
    %cst_2 = arith.constant dense<0.000000e+00> : vector<16x32xf32>
    %13 = tpu.matmul %9, %12, %cst_2 {dimension_numbers = #tpu.dot_dimension_numbers<[1], [0], [0], [1], [0, 0, 1, 1], [], []>} : vector<16x256xf32>, vector<256x32xf32>, vector<16x32xf32> -> vector<16x32xf32>
    %14 = arith.addf %2, %13 : vector<16x32xf32>
    %c1_i32 = arith.constant 1 : i32
    %c0_3 = arith.constant 0 : index
    %c0_4 = arith.constant 0 : index
    %15 = vector.load %arg2[%c0_3, %c0_4] : memref<16x32xf32, #tpu.memory_space<vmem>>, vector<16x32xf32>
    %16 = arith.addf %15, %14 : vector<16x32xf32>
    %c0_5 = arith.constant 0 : index
    %c0_6 = arith.constant 0 : index
    %17 = vector.load %arg4[%c0_5, %c0_6] : memref<16x32xf32, #tpu.memory_space<vmem>>, vector<16x32xf32>
    tpu.vector_store %arg4[%c0_5, %c0_6], %16 {strides = array<i32>} : memref<16x32xf32, #tpu.memory_space<vmem>>, vector<16x32xf32>,
    return
  }
  func.func @transform_0(%arg0: i32) -> (i32, i32) {
    %c0_i32 = arith.constant 0 : i32
    %c0_i32_0 = arith.constant 0 : i32
    return %arg0, %c0_i32 : i32, i32
  }
  func.func @transform_1(%arg0: i32) -> (i32, i32) {
    %c0_i32 = arith.constant 0 : i32
    %c0_i32_0 = arith.constant 0 : i32
    return %arg0, %c0_i32 : i32, i32
  }
  func.func @transform_2(%arg0: i32) -> (i32, i32) {
    %c0_i32 = arith.constant 0 : i32
    %c0_i32_0 = arith.constant 0 : i32
    %c0_i32_1 = arith.constant 0 : i32
    return %c0_i32, %c0_i32_0 : i32, i32
  }
  func.func @transform_3(%arg0: i32) -> (i32, i32) {
    %c0_i32 = arith.constant 0 : i32
    %c0_i32_0 = arith.constant 0 : i32
    return %arg0, %c0_i32 : i32, i32
  }
}

</mosaic_0001>

<bundles_post_ra>
// kernel: tpu_custom_call.1
= control target key start
LH: loop header
LB: loop body
LE: loop exit
PB: predicated region body
PF: predicated region fallthrough
CT: control target
= control target key end

     0   :  { %v213_v2 = vmov 0   ;;  %s349_s0 = inlined_call_operand.vmem [shape: s32[16,1], index: 0, kind: input, shape index: {}]   ;;  %s350_s1 = inlined_call_operand.vmem [shape: f32[16,32], index: 1, kind: input, shape index: {}]   ;;  %s351_s2 = inlined_call_operand.vmem [shape: f32[256,32], index: 2, kind: input, shape index: {}]   ;;  %s352_s3 = inlined_call_operand.hbm [shape: f32[16,32], index: 3, kind: output, shape index: {}]  }
   0x1   :  { %v16_v0 = vld [vmem:[%s349_s0 + $0x8] sm:$0xff]  ;;  %v53_v1 = vld [vmem:[%s351_s2 + $0x78] sm:$0xff]  ;;  %186 = vset.pattern.permute.xlu0 %v213_v2  ;;  %v52_v4 = vld [vmem:[%s351_s2 + $0x70] sm:$0xff] }
   0x2   :  { %149 = vmatpush.msra.mxu2 %v53_v1  ;;  %v69_v3 = vld [vmem:[%s351_s2 + $0xf8] sm:$0xff]  ;;  %v68_v5 = vld [vmem:[%s351_s2 + $0xf0] sm:$0xff]  ;;  %24 = vperm.xlu0 %186, %v16_v0   ;;  %v51_v6 = vld [vmem:[%s351_s2 + $0x68] sm:$0xff] }
   0x3   :  { %165 = vmatpush.msra.mxu3 %v69_v3  ;;  %v67_v7 = vld [vmem:[%s351_s2 + $0xe8] sm:$0xff]  ;;  %70 = vmatpush.msra.mxu0 %v53_v1  ;;  %v50_v8 = vld [vmem:[%s351_s2 + $0x60] sm:$0xff]  ;;  %v49_v10 = vld [vmem:[%s351_s2 + $0x58] sm:$0xff] }
   0x4   :  { %150 = vmatpush.msra.mxu2 %v52_v4  ;;  %93 = vmatpush.msra.mxu1 %v69_v3  ;;  %v66_v9 = vld [vmem:[%s351_s2 + $0xe0] sm:$0xff]  ;;  %v65_v12 = vld [vmem:[%s351_s2 + $0xd8] sm:$0xff]  ;;  %v48_v13 = vld [vmem:[%s351_s2 + $0x50] sm:$0xff] }
   0x5   :  { %166 = vmatpush.msra.mxu3 %v68_v5  ;;  %71 = vmatpush.msra.mxu0 %v52_v4  ;;  %v15_v11 = vld [vmem:[%s349_s0] sm:$0xff]  ;;  %v64_v14 = vld [vmem:[%s351_s2 + $0xd0] sm:$0xff]  ;;  %v47_v15 = vld [vmem:[%s351_s2 + $0x48] sm:$0xff] }
   0x6   :  { %151 = vmatpush.msra.mxu2 %v51_v6  ;;  %94 = vmatpush.msra.mxu1 %v68_v5 }
   0x7   :  { %167 = vmatpush.msra.mxu3 %v67_v7  ;;  %72 = vmatpush.msra.mxu0 %v51_v6 }
   0x8   :  { %152 = vmatpush.msra.mxu2 %v50_v8  ;;  %95 = vmatpush.msra.mxu1 %v67_v7 }
   0x9   :  { %168 = vmatpush.msra.mxu3 %v66_v9  ;;  %73 = vmatpush.msra.mxu0 %v50_v8 }
   0xa   :  { %153 = vmatpush.msra.mxu2 %v49_v10  ;;  %21 = vperm.xlu0 %186, %v15_v11  }
   0xb   :  { %169 = vmatpush.msra.mxu3 %v65_v12 }
   0xc   :  { %8 = vsyncpa [#allocation3], 0  ;;  %154 = vmatpush.msra.mxu2 %v48_v13  ;;  %v63_v16 = vld [vmem:[%s351_s2 + $0xc8] sm:$0xff]  ;;  %96 = vmatpush.msra.mxu1 %v66_v9  ;;  %v46_v17 = vld [vmem:[%s351_s2 + $0x40] sm:$0xff]  ;;  %v17_v35 = vlaneseq  ;;  %v214_v39 = vmov 1.0   ;;  %s215_s25 = smov [#allocation2]  }
   0xd   :  { %170 = vmatpush.msra.mxu3 %v64_v14  ;;  %74 = vmatpush.msra.mxu0 %v49_v10  ;;  %v62_v18 = vld [vmem:[%s351_s2 + $0xc0] sm:$0xff]  ;;  %v45_v19 = vld [vmem:[%s351_s2 + $0x38] sm:$0xff]  ;;  %v44_v21 = vld [vmem:[%s351_s2 + $0x30] sm:$0xff]  ;;  %s127_s26 = sshll.u32 %s215_s25, 4  ;;  %s129_s29 = sshll.u32 %s352_s3, 4  ;;  %vm120_vm4 = vcmask 261120   ;;  %s128_s26 = int_to_ptr.vmem [resolvable:$true] %s127_s26  ;;  %s130_s29 = int_to_ptr.hbm [resolvable:$true] %s129_s29 }
   0xe   :  { %155 = vmatpush.msra.mxu2 %v47_v15  ;;  %97 = vmatpush.msra.mxu1 %v65_v12  ;;  %v61_v20 = vld [vmem:[%s351_s2 + $0xb8] sm:$0xff]  ;;  %v60_v22 = vld [vmem:[%s351_s2 + $0xb0] sm:$0xff]  ;;  %v43_v23 = vld [vmem:[%s351_s2 + $0x28] sm:$0xff]  ;;  %v18_v36 = vand.u32 127, %v17_v35  ;;  %s216_s5 = smov 128   ;;  %s217_s6 = smov 8  }
   0xf   :  { %171 = vmatpush.msra.mxu3 %v63_v16  ;;  %75 = vmatpush.msra.mxu0 %v48_v13  ;;  %v59_v24 = vld [vmem:[%s351_s2 + $0xa8] sm:$0xff]  ;;  %v42_v25 = vld [vmem:[%s351_s2 + $0x20] sm:$0xff]  ;;  %v41_v27 = vld [vmem:[%s351_s2 + $0x18] sm:$0xff] }
  0x10   :  { %156 = vmatpush.msra.mxu2 %v46_v17  ;;  %98 = vmatpush.msra.mxu1 %v64_v14  ;;  %v58_v26 = vld [vmem:[%s351_s2 + $0xa0] sm:$0xff]  ;;  %v57_v28 = vld [vmem:[%s351_s2 + $0x98] sm:$0xff]  ;;  %v40_v29 = vld [vmem:[%s351_s2 + $0x10] sm:$0xff]  ;;  %v19_v37 = vadd.s32 128, %v18_v36 }
  0x11   :  { %172 = vmatpush.msra.mxu3 %v62_v18  ;;  %76 = vmatpush.msra.mxu0 %v47_v15  ;;  %v56_v30 = vld [vmem:[%s351_s2 + $0x90] sm:$0xff]  ;;  %v39_v31 = vld [vmem:[%s351_s2 + $0x8] sm:$0xff]  ;;  %v38_v33 = vld [vmem:[%s351_s2] sm:$0xff] }
  0x12   :  { %157 = vmatpush.msra.mxu2 %v45_v19  ;;  %99 = vmatpush.msra.mxu1 %v63_v16  ;;  %v55_v32 = vld [vmem:[%s351_s2 + $0x88] sm:$0xff]  ;;  %v54_v34 = vld [vmem:[%s351_s2 + $0x80] sm:$0xff] }
  0x13   :  { %173 = vmatpush.msra.mxu3 %v61_v20  ;;  %77 = vmatpush.msra.mxu0 %v46_v17  ;;  %v117_v43 = vld [vmem:[%s350_s1 + $0x8] sm:$0xff]  ;;  %v116_v47 = vld [vmem:[%s350_s1] sm:$0xff] }
  0x14   :  { %158 = vmatpush.msra.mxu2 %v44_v21  ;;  %100 = vmatpush.msra.mxu1 %v62_v18 }
  0x15   :  { %174 = vmatpush.msra.mxu3 %v60_v22  ;;  %78 = vmatpush.msra.mxu0 %v45_v19 }
  0x16   :  { %159 = vmatpush.msra.mxu2 %v43_v23  ;;  %101 = vmatpush.msra.mxu1 %v61_v20 }
  0x17   :  { %175 = vmatpush.msra.mxu3 %v59_v24  ;;  %79 = vmatpush.msra.mxu0 %v44_v21 }
  0x18   :  { %160 = vmatpush.msra.mxu2 %v42_v25  ;;  %102 = vmatpush.msra.mxu1 %v60_v22 }
  0x19   :  { %176 = vmatpush.msra.mxu3 %v58_v26  ;;  %80 = vmatpush.msra.mxu0 %v43_v23 }
  0x1a   :  { %161 = vmatpush.msra.mxu2 %v41_v27  ;;  %103 = vmatpush.msra.mxu1 %v59_v24 }
  0x1b   :  { %177 = vmatpush.msra.mxu3 %v57_v28  ;;  %81 = vmatpush.msra.mxu0 %v42_v25 }
  0x1c   :  { %162 = vmatpush.msra.mxu2 %v40_v29  ;;  %104 = vmatpush.msra.mxu1 %v58_v26 }
  0x1d   :  { %178 = vmatpush.msra.mxu3 %v56_v30  ;;  %82 = vmatpush.msra.mxu0 %v41_v27 }
  0x1e   :  { %163 = vmatpush.msra.mxu2 %v39_v31  ;;  %105 = vmatpush.msra.mxu1 %v57_v28 }
  0x1f   :  { %179 = vmatpush.msra.mxu3 %v55_v32  ;;  %83 = vmatpush.msra.mxu0 %v40_v29 }
  0x20   :  { %106 = vmatpush.msra.mxu1 %v56_v30  ;;  %164 = vmatpush.msra.mxu2 %v38_v33 }
  0x21   :  { %84 = vmatpush.msra.mxu0 %v39_v31  ;;  %180 = vmatpush.msra.mxu3 %v54_v34 }
  0x22   :  { %107 = vmatpush.msra.mxu1 %v55_v32 }
  0x23   :  { %85 = vmatpush.msra.mxu0 %v38_v33 }
  0x24   :  { %108 = vmatpush.msra.mxu1 %v54_v34 }
  0x74   :  { %v25_v38 = vpop.permute.xlu0 %24 }
  0x75   :  { %vm28_vm0 = vcmp.eq.s32.totalorder %v18_v36, %v25_v38  ;;  %vm29_vm1 = vcmp.eq.s32.totalorder %v19_v37, %v25_v38 }
  0x76   :  { %146 = vmatmul.msk.f32.vlgmr.msra.gmra.mxu2 %vm28_vm0, %v214_v39  ;;  %148 = vmatmul.msk.f32.vlgmr.msra.gmra.mxu3 %vm29_vm1, %v214_v39 }
  0x7c   :  { %v22_v40 = vpop.permute.xlu0 %21 }
  0x7d   :  { %vm26_vm2 = vcmp.eq.s32.totalorder %v18_v36, %v22_v40  ;;  %vm27_vm3 = vcmp.eq.s32.totalorder %v19_v37, %v22_v40 }
  0x7e   :  { %145 = vmatmul.msk.f32.vlgmr.msra.gmra.mxu0 %vm26_vm2, %v214_v39  ;;  %147 = vmatmul.msk.f32.vlgmr.msra.gmra.mxu1 %vm27_vm3, %v214_v39 }
  0xf9   :  { %v90_v41 = vpop.f32.mrf.mxu2  ;;  %v113_v42 = vpop.f32.mrf.mxu3 }
  0xfa   :  { %v114_v44 = vadd.f32 %v113_v42, %v90_v41 }
  0xfb   :  { %v87_v45 = vpop.f32.mrf.mxu0  ;;  %v110_v46 = vpop.f32.mrf.mxu1 }
  0xfc   :  { %v119_v48 = vadd.f32 %v117_v43, %v114_v44  ;;  %v111_v49 = vadd.f32 %v110_v46, %v87_v45 }
  0xfe   :  { %122 = vst.msk [vmem:[#allocation2 + $0x8] sm:$0xff] %vm120_vm4, %v119_v48  ;;  %v118_v50 = vadd.f32 %v116_v47, %v111_v49 }
 0x100   :  { %121 = vst.msk [vmem:[#allocation2] sm:$0xff] %vm120_vm4, %v118_v50 }
 0x101   :  { %135 = dma.vmem_to_hbm [thread:$0]  %s128_s26, 256, %s130_s29, [#allocation3], %s216_s5, %s216_s5, %s217_s6  }
 0x102   :  { %211 = dma.done.wait [#allocation3], 256  }
 0x103   :  { %212 = vsyncadd [#allocation3], 4294967040 }
 0x104   :  { %140 = vsyncpa [#allocation3], 1 }

</bundles_post_ra>
